<compile_context>
chip_gen: v5e
topology: v5e:2x2
jax: 0.10.0
libtpu: 0.0.40
codegen_flags: <defaults>
</compile_context>

<pallas_src>
import functools
import math

import jax
import jax.numpy as jnp
from jax.experimental import pallas as pl
from jax.experimental.pallas import tpu as pltpu

_EPS = 1e-5
# Large finite negative instead of -inf: identical softmax for rows with at
# least one valid key (exp underflows to exactly 0), avoids NaN for rows that
# are fully masked.
_MASK_NEG = -1e30
_VMEM_LIMIT = 48 * 1024 * 1024  # headroom under v7x's 64 MiB per-TC VMEM


# -----------------------------------------------------------------------------
# Kernels
# -----------------------------------------------------------------------------
def _mha_kernel(q_ref, kv_ref, mask_ref, npad_ref,
                wq_ref, bq_ref, wk_ref, bk_ref, wv_ref, bv_ref,
                wo_ref, bo_ref, gamma_ref, beta_ref,
                out_ref, attn_ref, *, inv_temp, eps):
    """Head-batched MHA + output proj + residual + LayerNorm + non-pad mask.

    Block shapes (per grid point (b, q_tile)):
      q_ref    (1, tq, D)        f32   (query tile; also the residual)
      kv_ref   (1, Tk, D)        bf16  (full key/value sequence of batch b)
      mask_ref (1, tq, Tk)       bf16  (1.0 == masked)
      npad_ref (1, tq, 1)        f32
      wq/wk/wv (H, D, dk|dv)     bf16  (head-major weights, resident)
      bq/bk/bv (H, 1, dk|dv)     f32
      wo       (H, dv, D)        bf16
      bo/gamma/beta (1, D)       f32
      out_ref  (1, tq, D)        f32
      attn_ref (H, 1, tq, Tk)    f32   (== PyTorch view(H*B, Tq, Tk) ordering)
    """
    _, tq, D = q_ref.shape
    Tk = kv_ref.shape[1]
    H = wq_ref.shape[0]

    q_f32 = q_ref[0].astype(jnp.float32)            # (tq, D) residual / LN in f32
    q_bf = q_f32.astype(jnp.bfloat16)
    kv_bf = kv_ref[0]                               # (Tk, D) bf16

    qb = jnp.broadcast_to(q_bf[None], (H, tq, D))
    kvb = jnp.broadcast_to(kv_bf[None], (H, Tk, D))

    # Head-batched projections: single batched MXU op per tensor (no per-head
    # Python loop, no 8-wide lane slices).
    qh = jnp.einsum('hqd,hde->hqe', qb, wq_ref[...],
                    preferred_element_type=jnp.float32) + bq_ref[...]
    kh = jnp.einsum('hkd,hde->hke', kvb, wk_ref[...],
                    preferred_element_type=jnp.float32) + bk_ref[...]
    vh = jnp.einsum('hkd,hde->hke', kvb, wv_ref[...],
                    preferred_element_type=jnp.float32) + bv_ref[...]

    # Scores: bf16 MXU inputs, f32 accumulate; 1/temperature as a single multiply.
    s = jnp.einsum('hqe,hke->hqk', qh.astype(jnp.bfloat16), kh.astype(jnp.bfloat16),
                   preferred_element_type=jnp.float32) * inv_temp
    masked = mask_ref[0][None] > 0.5                # (1, tq, Tk) bool
    s = jnp.where(masked, jnp.float32(_MASK_NEG), s)

    # Softmax in f32; divide goes to the idle EUP via approximate reciprocal.
    m = jnp.max(s, axis=-1, keepdims=True)
    e = jnp.exp(s - m)
    p = e * pl.reciprocal(jnp.sum(e, axis=-1, keepdims=True), approx=True)

    attn_ref[...] = p.reshape(H, 1, tq, Tk)

    # Context and output projection (head-batched matmul + reduce over heads).
    ctx = jnp.einsum('hqk,hkv->hqv', p.astype(jnp.bfloat16), vh.astype(jnp.bfloat16),
                     preferred_element_type=jnp.float32)            # (H, tq, dv)
    yo = jnp.einsum('hqv,hvd->hqd', ctx.astype(jnp.bfloat16), wo_ref[...],
                    preferred_element_type=jnp.float32)             # (H, tq, D)
    y = jnp.sum(yo, axis=0) + bo_ref[...] + q_f32                   # bias + residual

    # LayerNorm (f32) + affine + non-pad mask.
    mean = jnp.mean(y, axis=-1, keepdims=True)
    var = jnp.mean(jnp.square(y - mean), axis=-1, keepdims=True)
    y = (y - mean) * jax.lax.rsqrt(var + eps)
    y = y * gamma_ref[...] + beta_ref[...]
    y = y * npad_ref[0]
    out_ref[...] = y.reshape(1, tq, D).astype(out_ref.dtype)


def _ffn_kernel(x_ref, npad_ref, w1_ref, b1_ref, w2_ref, b2_ref,
                gamma_ref, beta_ref, out_ref, *, eps):
    """Position-wise FFN (Conv1d k=1 == matmul) + residual + LayerNorm + mask.

    Operates on a flattened (rows, D) tile; weights resident.
    """
    x = x_ref[...].astype(jnp.float32)                              # (tr, D)
    h = jnp.dot(x.astype(jnp.bfloat16), w1_ref[...],
                preferred_element_type=jnp.float32) + b1_ref[...]
    h = jnp.maximum(h, 0.0)                                         # ReLU
    y = jnp.dot(h.astype(jnp.bfloat16), w2_ref[...],
                preferred_element_type=jnp.float32) + b2_ref[...]
    y = y + x                                                       # residual
    mean = jnp.mean(y, axis=-1, keepdims=True)
    var = jnp.mean(jnp.square(y - mean), axis=-1, keepdims=True)
    y = (y - mean) * jax.lax.rsqrt(var + eps)
    y = y * gamma_ref[...] + beta_ref[...]
    y = y * npad_ref[...]
    out_ref[...] = y.astype(out_ref.dtype)


# -----------------------------------------------------------------------------
# Wrappers (pallas_call plumbing)
# -----------------------------------------------------------------------------
def _pick_tile(n, candidates):
    for c in candidates:
        if n % c == 0:
            return c
    return n


def mha_forward(q, kv, attn_mask, non_pad_mask, p, *, num_heads, dim_key, dim_value):
    B, Tq, D = q.shape
    Tk = kv.shape[1]
    tq = _pick_tile(Tq, (128,))
    inv_temp = 1.0 / math.sqrt(float(dim_key))

    # Activation / mask dtype plumbing: q stays f32 (residual + LayerNorm);
    # kv and masks are only matmul / compare inputs -> bf16 halves their DMA.
    q_f32 = q.astype(jnp.float32)
    kv_bf = kv.astype(jnp.bfloat16)
    mask_bf = attn_mask.astype(jnp.bfloat16)
    npad = non_pad_mask.astype(jnp.float32).reshape(B, Tq, 1)

    # Head-major weights so the kernel never slices the lane axis per head.
    wq_h = p['wq'].reshape(D, num_heads, dim_key).transpose(1, 0, 2).astype(jnp.bfloat16)
    wk_h = p['wk'].reshape(D, num_heads, dim_key).transpose(1, 0, 2).astype(jnp.bfloat16)
    wv_h = p['wv'].reshape(D, num_heads, dim_value).transpose(1, 0, 2).astype(jnp.bfloat16)
    wo_h = p['wo'].reshape(num_heads, dim_value, D).astype(jnp.bfloat16)
    bq_h = p['bq'].reshape(num_heads, 1, dim_key).astype(jnp.float32)
    bk_h = p['bk'].reshape(num_heads, 1, dim_key).astype(jnp.float32)
    bv_h = p['bv'].reshape(num_heads, 1, dim_value).astype(jnp.float32)

    inputs = (q_f32, kv_bf, mask_bf, npad,
              wq_h, bq_h, wk_h, bk_h, wv_h, bv_h,
              wo_h, p['bo'].astype(jnp.float32),
              p['gamma'].astype(jnp.float32), p['beta'].astype(jnp.float32))

    in_specs = [
        pl.BlockSpec((1, tq, D), lambda b, i: (b, i, 0)),          # q tile
        pl.BlockSpec((1, Tk, D), lambda b, i: (b, 0, 0)),          # full keys of batch b
        pl.BlockSpec((1, tq, Tk), lambda b, i: (b, i, 0)),         # mask tile
        pl.BlockSpec((1, tq, 1), lambda b, i: (b, i, 0)),          # non-pad tile
    ] + [pl.BlockSpec(a.shape, lambda b, i, _nd=a.ndim: (0,) * _nd)  # resident weights
         for a in inputs[4:]]

    out_specs = [
        pl.BlockSpec((1, tq, D), lambda b, i: (b, i, 0)),
        pl.BlockSpec((num_heads, 1, tq, Tk), lambda b, i: (0, b, i, 0)),
    ]

    kernel = functools.partial(_mha_kernel, inv_temp=inv_temp, eps=_EPS)
    out, attn = pl.pallas_call(
        kernel,
        grid=(B, Tq // tq),
        in_specs=in_specs,
        out_specs=out_specs,
        out_shape=(jax.ShapeDtypeStruct((B, Tq, D), jnp.float32),
                   jax.ShapeDtypeStruct((num_heads, B, Tq, Tk), jnp.float32)),
        compiler_params=pltpu.CompilerParams(
            dimension_semantics=("parallel", "parallel"),
            vmem_limit_bytes=_VMEM_LIMIT),
    )(*inputs)
    # (H, B, Tq, Tk) -> (H*B, Tq, Tk) is a free reshape matching PyTorch ordering.
    return out, attn.reshape(num_heads * B, Tq, Tk)


def ffn_forward(x, non_pad_mask, p):
    B, T, D = x.shape
    R = B * T
    tr = _pick_tile(R, (512, 256, 128))

    x2 = x.reshape(R, D).astype(jnp.float32)
    npad2 = non_pad_mask.astype(jnp.float32).reshape(R, 1)

    inputs = (x2, npad2,
              p['w1'].astype(jnp.bfloat16), p['b1'].astype(jnp.float32),
              p['w2'].astype(jnp.bfloat16), p['b2'].astype(jnp.float32),
              p['gamma'].astype(jnp.float32), p['beta'].astype(jnp.float32))

    in_specs = [
        pl.BlockSpec((tr, D), lambda r: (r, 0)),
        pl.BlockSpec((tr, 1), lambda r: (r, 0)),
    ] + [pl.BlockSpec(a.shape, lambda r, _nd=a.ndim: (0,) * _nd) for a in inputs[2:]]

    out = pl.pallas_call(
        functools.partial(_ffn_kernel, eps=_EPS),
        grid=(R // tr,),
        in_specs=in_specs,
        out_specs=pl.BlockSpec((tr, D), lambda r: (r, 0)),
        out_shape=jax.ShapeDtypeStruct((R, D), jnp.float32),
        compiler_params=pltpu.CompilerParams(
            dimension_semantics=("parallel",),
            vmem_limit_bytes=_VMEM_LIMIT),
    )(*inputs)
    return out.reshape(B, T, D)


def decoder_layer_forward(decoder_input, encoder_output, non_pad_mask,
                          self_attn_mask, dec_enc_attn_mask, params,
                          *, num_heads, dim_key, dim_value):
    out, self_attn = mha_forward(decoder_input, decoder_input, self_attn_mask,
                                 non_pad_mask, params['self_attn'],
                                 num_heads=num_heads, dim_key=dim_key,
                                 dim_value=dim_value)
    out, enc_attn = mha_forward(out, encoder_output, dec_enc_attn_mask,
                                non_pad_mask, params['encoder_attn'],
                                num_heads=num_heads, dim_key=dim_key,
                                dim_value=dim_value)
    out = ffn_forward(out, non_pad_mask, params['pos_ffn'])
    return out, self_attn, enc_attn


# -----------------------------------------------------------------------------
# Deterministic parameter init (shapes match nn.Linear / nn.Conv1d / nn.LayerNorm)
# -----------------------------------------------------------------------------
def init_mha_params(key, dim_model, num_heads, dim_key, dim_value):
    ks = jax.random.split(key, 8)
    std_qk = math.sqrt(2.0 / (dim_model + dim_key))
    std_v = math.sqrt(2.0 / (dim_model + dim_value))
    std_o = math.sqrt(2.0 / (num_heads * dim_value + dim_model))
    return dict(
        wq=std_qk * jax.random.normal(ks[0], (dim_model, num_heads * dim_key), jnp.float32),
        bq=0.01 * jax.random.normal(ks[1], (1, num_heads * dim_key), jnp.float32),
        wk=std_qk * jax.random.normal(ks[2], (dim_model, num_heads * dim_key), jnp.float32),
        bk=0.01 * jax.random.normal(ks[3], (1, num_heads * dim_key), jnp.float32),
        wv=std_v * jax.random.normal(ks[4], (dim_model, num_heads * dim_value), jnp.float32),
        bv=0.01 * jax.random.normal(ks[5], (1, num_heads * dim_value), jnp.float32),
        wo=std_o * jax.random.normal(ks[6], (num_heads * dim_value, dim_model), jnp.float32),
        bo=0.01 * jax.random.normal(ks[7], (1, dim_model), jnp.float32),
        gamma=jnp.ones((1, dim_model), jnp.float32),
        beta=jnp.zeros((1, dim_model), jnp.float32),
    )


def init_ffn_params(key, dim_model, dim_inner):
    ks = jax.random.split(key, 4)
    std1 = math.sqrt(1.0 / dim_model)
    std2 = math.sqrt(1.0 / dim_inner)
    return dict(
        w1=std1 * jax.random.normal(ks[0], (dim_model, dim_inner), jnp.float32),
        b1=0.01 * jax.random.normal(ks[1], (1, dim_inner), jnp.float32),
        w2=std2 * jax.random.normal(ks[2], (dim_inner, dim_model), jnp.float32),
        b2=0.01 * jax.random.normal(ks[3], (1, dim_model), jnp.float32),
        gamma=jnp.ones((1, dim_model), jnp.float32),
        beta=jnp.zeros((1, dim_model), jnp.float32),
    )


# -----------------------------------------------------------------------------
# Main
# -----------------------------------------------------------------------------
if __name__ == "__main__":
    B, T_dec, T_enc = 2, 8, 16
    dim_model, dim_inner = 32, 64
    num_heads, dim_key, dim_value = 4, 8, 8

    root = jax.random.PRNGKey(0)
    k_in, k_enc, k_p1, k_p2, k_p3 = jax.random.split(root, 5)

    decoder_input = jax.random.normal(k_in, (B, T_dec, dim_model), jnp.float32)
    encoder_output = jax.random.normal(k_enc, (B, T_enc, dim_model), jnp.float32)

    # self_attn_mask: causal mask (1.0 = masked), broadcast over batch.
    causal = jnp.triu(jnp.ones((T_dec, T_dec), jnp.float32), k=1)
    self_attn_mask = jnp.broadcast_to(causal, (B, T_dec, T_dec))

    # dec_enc_attn_mask: mask padded encoder positions per batch (enc_len = [16, 12]).
    enc_len = jnp.array([16, 12])
    enc_pos = jnp.arange(T_enc)[None, None, :]
    dec_enc_attn_mask = (enc_pos >= enc_len[:, None, None]).astype(jnp.float32)
    dec_enc_attn_mask = jnp.broadcast_to(dec_enc_attn_mask, (B, T_dec, T_enc))

    # non_pad_mask: decoder valid positions (dec_len = [8, 6]).
    dec_len = jnp.array([8, 6])
    dec_pos = jnp.arange(T_dec)[None, :, None]
    non_pad_mask = (dec_pos < dec_len[:, None, None]).astype(jnp.float32)

    params = dict(
        self_attn=init_mha_params(k_p1, dim_model, num_heads, dim_key, dim_value),
        encoder_attn=init_mha_params(k_p2, dim_model, num_heads, dim_key, dim_value),
        pos_ffn=init_ffn_params(k_p3, dim_model, dim_inner),
    )

    dec_out, self_attn, enc_attn = decoder_layer_forward(
        decoder_input, encoder_output, non_pad_mask,
        self_attn_mask, dec_enc_attn_mask, params,
        num_heads=num_heads, dim_key=dim_key, dim_value=dim_value)

    jax.block_until_ready((dec_out, self_attn, enc_attn))
    assert dec_out.shape == (B, T_dec, dim_model)
    assert self_attn.shape == (num_heads * B, T_dec, T_dec)
    assert enc_attn.shape == (num_heads * B, T_dec, T_enc)
    assert bool(jnp.all(jnp.isfinite(dec_out)))
    print("KERNEL_OK")
</pallas_src>

<mosaic_0001>
module attributes {stable_mosaic.version = 11 : i64} {
  func.func @_mha_kernel(%arg0: i32, %arg1: i32, %arg2: memref<1x8x32xf32, #tpu.memory_space<vmem>>, %arg3: memref<1x8x32xbf16, #tpu.memory_space<vmem>>, %arg4: memref<1x8x8xbf16, #tpu.memory_space<vmem>>, %arg5: memref<1x8x1xf32, #tpu.memory_space<vmem>>, %arg6: memref<4x32x8xbf16, #tpu.memory_space<vmem>>, %arg7: memref<4x1x8xf32, #tpu.memory_space<vmem>>, %arg8: memref<4x32x8xbf16, #tpu.memory_space<vmem>>, %arg9: memref<4x1x8xf32, #tpu.memory_space<vmem>>, %arg10: memref<4x32x8xbf16, #tpu.memory_space<vmem>>, %arg11: memref<4x1x8xf32, #tpu.memory_space<vmem>>, %arg12: memref<4x8x32xbf16, #tpu.memory_space<vmem>>, %arg13: memref<1x32xf32, #tpu.memory_space<vmem>>, %arg14: memref<1x32xf32, #tpu.memory_space<vmem>>, %arg15: memref<1x32xf32, #tpu.memory_space<vmem>>, %arg16: memref<1x8x32xf32, #tpu.memory_space<vmem>>, %arg17: memref<4x1x8x8xf32, #tpu.memory_space<vmem>>) attributes {dimension_semantics = [#tpu.dimension_semantics<parallel>, #tpu.dimension_semantics<parallel>], iteration_bounds = array<i64: 2, 1>, scalar_prefetch = 0 : i64, scratch_operands = 0 : i64, tpu.core_type = #tpu.core_type<tc>, window_params = [{transform_indices = @transform_0, window_bounds = array<i64: 1, 8, 32>}, {transform_indices = @transform_1, window_bounds = array<i64: 1, 8, 32>}, {transform_indices = @transform_2, window_bounds = array<i64: 1, 8, 8>}, {transform_indices = @transform_3, window_bounds = array<i64: 1, 8, 1>}, {pipeline_mode = #tpu.pipeline_mode<synchronous>, transform_indices = @transform_4, window_bounds = array<i64: 4, 32, 8>}, {pipeline_mode = #tpu.pipeline_mode<synchronous>, transform_indices = @transform_5, window_bounds = array<i64: 4, 1, 8>}, {pipeline_mode = #tpu.pipeline_mode<synchronous>, transform_indices = @transform_6, window_bounds = array<i64: 4, 32, 8>}, {pipeline_mode = #tpu.pipeline_mode<synchronous>, transform_indices = @transform_7, window_bounds = array<i64: 4, 1, 8>}, {pipeline_mode = #tpu.pipeline_mode<synchronous>, transform_indices = @transform_8, window_bounds = array<i64: 4, 32, 8>}, {pipeline_mode = #tpu.pipeline_mode<synchronous>, transform_indices = @transform_9, window_bounds = array<i64: 4, 1, 8>}, {pipeline_mode = #tpu.pipeline_mode<synchronous>, transform_indices = @transform_10, window_bounds = array<i64: 4, 8, 32>}, {pipeline_mode = #tpu.pipeline_mode<synchronous>, transform_indices = @transform_11, window_bounds = array<i64: 1, 32>}, {pipeline_mode = #tpu.pipeline_mode<synchronous>, transform_indices = @transform_12, window_bounds = array<i64: 1, 32>}, {pipeline_mode = #tpu.pipeline_mode<synchronous>, transform_indices = @transform_13, window_bounds = array<i64: 1, 32>}, {transform_indices = @transform_14, window_bounds = array<i64: 1, 8, 32>}, {transform_indices = @transform_15, window_bounds = array<i64: 4, 1, 8, 8>}]} {
    %c0 = arith.constant 0 : index
    %c0_0 = arith.constant 0 : index
    %c0_1 = arith.constant 0 : index
    %0 = vector.load %arg2[%c0, %c0_0, %c0_1] : memref<1x8x32xf32, #tpu.memory_space<vmem>>, vector<1x8x32xf32>
    %1 = vector.shape_cast %0 : vector<1x8x32xf32> to vector<8x32xf32>
    %2 = arith.truncf %1 : vector<8x32xf32> to vector<8x32xbf16>
    %c0_2 = arith.constant 0 : index
    %c0_3 = arith.constant 0 : index
    %c0_4 = arith.constant 0 : index
    %3 = vector.load %arg3[%c0_2, %c0_3, %c0_4] : memref<1x8x32xbf16, #tpu.memory_space<vmem>>, vector<1x8x32xbf16>
    %4 = vector.shape_cast %3 : vector<1x8x32xbf16> to vector<8x32xbf16>
    %5 = vector.shape_cast %2 : vector<8x32xbf16> to vector<1x8x32xbf16>
    %6 = vector.shape_cast %5 : vector<1x8x32xbf16> to vector<1x8x32xbf16>
    %7 = vector.broadcast %6 : vector<1x8x32xbf16> to vector<4x8x32xbf16>
    %8 = vector.shape_cast %4 : vector<8x32xbf16> to vector<1x8x32xbf16>
    %9 = vector.shape_cast %8 : vector<1x8x32xbf16> to vector<1x8x32xbf16>
    %10 = vector.broadcast %9 : vector<1x8x32xbf16> to vector<4x8x32xbf16>
    %c0_5 = arith.constant 0 : index
    %c0_6 = arith.constant 0 : index
    %c0_7 = arith.constant 0 : index
    %11 = vector.load %arg6[%c0_5, %c0_6, %c0_7] : memref<4x32x8xbf16, #tpu.memory_space<vmem>>, vector<4x32x8xbf16>
    "tpu.trace_start"() <{level = 10 : i32, message = "hqd,hde->hqe"}> : () -> ()
    %cst = arith.constant dense<0.000000e+00> : vector<4x8x8xf32>
    %12 = tpu.matmul %7, %11, %cst {dimension_numbers = #tpu.dot_dimension_numbers<[2], [1], [1], [2], [0, 0, 0, 1, 1, 2], [0], [0]>} : vector<4x8x32xbf16>, vector<4x32x8xbf16>, vector<4x8x8xf32> -> vector<4x8x8xf32>
    "tpu.trace_stop"() : () -> ()
    %c0_8 = arith.constant 0 : index
    %c0_9 = arith.constant 0 : index
    %c0_10 = arith.constant 0 : index
    %13 = vector.load %arg7[%c0_8, %c0_9, %c0_10] : memref<4x1x8xf32, #tpu.memory_space<vmem>>, vector<4x1x8xf32>
    %14 = vector.broadcast %13 : vector<4x1x8xf32> to vector<4x8x8xf32>
    %15 = arith.addf %12, %14 : vector<4x8x8xf32>
    %c0_11 = arith.constant 0 : index
    %c0_12 = arith.constant 0 : index
    %c0_13 = arith.constant 0 : index
    %16 = vector.load %arg8[%c0_11, %c0_12, %c0_13] : memref<4x32x8xbf16, #tpu.memory_space<vmem>>, vector<4x32x8xbf16>
    "tpu.trace_start"() <{level = 10 : i32, message = "hkd,hde->hke"}> : () -> ()
    %cst_14 = arith.constant dense<0.000000e+00> : vector<4x8x8xf32>
    %17 = tpu.matmul %10, %16, %cst_14 {dimension_numbers = #tpu.dot_dimension_numbers<[2], [1], [1], [2], [0, 0, 0, 1, 1, 2], [0], [0]>} : vector<4x8x32xbf16>, vector<4x32x8xbf16>, vector<4x8x8xf32> -> vector<4x8x8xf32>
    "tpu.trace_stop"() : () -> ()
    %c0_15 = arith.constant 0 : index
    %c0_16 = arith.constant 0 : index
    %c0_17 = arith.constant 0 : index
    %18 = vector.load %arg9[%c0_15, %c0_16, %c0_17] : memref<4x1x8xf32, #tpu.memory_space<vmem>>, vector<4x1x8xf32>
    %19 = vector.broadcast %18 : vector<4x1x8xf32> to vector<4x8x8xf32>
    %20 = arith.addf %17, %19 : vector<4x8x8xf32>
    %c0_18 = arith.constant 0 : index
    %c0_19 = arith.constant 0 : index
    %c0_20 = arith.constant 0 : index
    %21 = vector.load %arg10[%c0_18, %c0_19, %c0_20] : memref<4x32x8xbf16, #tpu.memory_space<vmem>>, vector<4x32x8xbf16>
    "tpu.trace_start"() <{level = 10 : i32, message = "hkd,hde->hke"}> : () -> ()
    %cst_21 = arith.constant dense<0.000000e+00> : vector<4x8x8xf32>
    %22 = tpu.matmul %10, %21, %cst_21 {dimension_numbers = #tpu.dot_dimension_numbers<[2], [1], [1], [2], [0, 0, 0, 1, 1, 2], [0], [0]>} : vector<4x8x32xbf16>, vector<4x32x8xbf16>, vector<4x8x8xf32> -> vector<4x8x8xf32>
    "tpu.trace_stop"() : () -> ()
    %c0_22 = arith.constant 0 : index
    %c0_23 = arith.constant 0 : index
    %c0_24 = arith.constant 0 : index
    %23 = vector.load %arg11[%c0_22, %c0_23, %c0_24] : memref<4x1x8xf32, #tpu.memory_space<vmem>>, vector<4x1x8xf32>
    %24 = vector.broadcast %23 : vector<4x1x8xf32> to vector<4x8x8xf32>
    %25 = arith.addf %22, %24 : vector<4x8x8xf32>
    %26 = arith.truncf %15 : vector<4x8x8xf32> to vector<4x8x8xbf16>
    %27 = arith.truncf %20 : vector<4x8x8xf32> to vector<4x8x8xbf16>
    "tpu.trace_start"() <{level = 10 : i32, message = "hqe,hke->hqk"}> : () -> ()
    %cst_25 = arith.constant dense<0.000000e+00> : vector<4x8x8xf32>
    %28 = tpu.matmul %26, %27, %cst_25 {dimension_numbers = #tpu.dot_dimension_numbers<[2], [2], [1], [1], [0, 0, 0, 1, 1, 1], [0], [0]>} : vector<4x8x8xbf16>, vector<4x8x8xbf16>, vector<4x8x8xf32> -> vector<4x8x8xf32>
    "tpu.trace_stop"() : () -> ()
    %cst_26 = arith.constant 0.353553385 : f32
    %29 = vector.broadcast %cst_26 : f32 to vector<4x8x8xf32>
    %30 = arith.mulf %28, %29 : vector<4x8x8xf32>
    %c0_27 = arith.constant 0 : index
    %c0_28 = arith.constant 0 : index
    %c0_29 = arith.constant 0 : index
    %31 = vector.load %arg4[%c0_27, %c0_28, %c0_29] : memref<1x8x8xbf16, #tpu.memory_space<vmem>>, vector<1x8x8xbf16>
    %32 = vector.shape_cast %31 : vector<1x8x8xbf16> to vector<8x8xbf16>
    %33 = vector.shape_cast %32 : vector<8x8xbf16> to vector<1x8x8xbf16>
    %cst_30 = arith.constant 5.000000e-01 : bf16
    %34 = vector.broadcast %cst_30 : bf16 to vector<1x8x8xbf16>
    %35 = arith.cmpf ogt, %33, %34 : vector<1x8x8xbf16>
    %cst_31 = arith.constant -1.000000e+30 : f32
    %36 = vector.shape_cast %35 : vector<1x8x8xi1> to vector<1x8x8xi1>
    %37 = vector.broadcast %36 : vector<1x8x8xi1> to vector<4x8x8xi1>
    %38 = vector.broadcast %cst_31 : f32 to vector<4x8x8xf32>
    %39 = arith.select %37, %38, %30 : vector<4x8x8xi1>, vector<4x8x8xf32>
    %cst_32 = arith.constant dense<0xFF800000> : vector<4x8xf32>
    %40 = vector.multi_reduction <maximumf>, %39, %cst_32 [2] : vector<4x8x8xf32> to vector<4x8xf32>
    %41 = vector.shape_cast %40 : vector<4x8xf32> to vector<4x8x1xf32>
    %42 = vector.broadcast %41 : vector<4x8x1xf32> to vector<4x8x8xf32>
    %43 = arith.subf %39, %42 : vector<4x8x8xf32>
    %44 = math.exp %43 : vector<4x8x8xf32>
    %cst_33 = arith.constant dense<0.000000e+00> : vector<4x8xf32>
    %45 = vector.multi_reduction <add>, %44, %cst_33 [2] : vector<4x8x8xf32> to vector<4x8xf32>
    %46 = vector.shape_cast %45 : vector<4x8xf32> to vector<4x8x1xf32>
    %47 = tpu.reciprocal %46 {approx = true} : vector<4x8x1xf32> -> vector<4x8x1xf32>
    %48 = vector.broadcast %47 : vector<4x8x1xf32> to vector<4x8x8xf32>
    %49 = arith.mulf %44, %48 : vector<4x8x8xf32>
    %50 = vector.shape_cast %49 : vector<4x8x8xf32> to vector<4x1x8x8xf32>
    %c0_34 = arith.constant 0 : index
    %c0_35 = arith.constant 0 : index
    %c0_36 = arith.constant 0 : index
    %c0_37 = arith.constant 0 : index
    %51 = vector.load %arg17[%c0_34, %c0_35, %c0_36, %c0_37] : memref<4x1x8x8xf32, #tpu.memory_space<vmem>>, vector<4x1x8x8xf32>
    tpu.vector_store %arg17[%c0_34, %c0_35, %c0_36, %c0_37], %50 {strides = array<i32>} : memref<4x1x8x8xf32, #tpu.memory_space<vmem>>, vector<4x1x8x8xf32>,
    %52 = arith.truncf %49 : vector<4x8x8xf32> to vector<4x8x8xbf16>
    %53 = arith.truncf %25 : vector<4x8x8xf32> to vector<4x8x8xbf16>
    "tpu.trace_start"() <{level = 10 : i32, message = "hqk,hkv->hqv"}> : () -> ()
    %cst_38 = arith.constant dense<0.000000e+00> : vector<4x8x8xf32>
    %54 = tpu.matmul %52, %53, %cst_38 {dimension_numbers = #tpu.dot_dimension_numbers<[2], [1], [1], [2], [0, 0, 0, 1, 1, 2], [0], [0]>} : vector<4x8x8xbf16>, vector<4x8x8xbf16>, vector<4x8x8xf32> -> vector<4x8x8xf32>
    "tpu.trace_stop"() : () -> ()
    %55 = arith.truncf %54 : vector<4x8x8xf32> to vector<4x8x8xbf16>
    %c0_39 = arith.constant 0 : index
    %c0_40 = arith.constant 0 : index
    %c0_41 = arith.constant 0 : index
    %56 = vector.load %arg12[%c0_39, %c0_40, %c0_41] : memref<4x8x32xbf16, #tpu.memory_space<vmem>>, vector<4x8x32xbf16>
    "tpu.trace_start"() <{level = 10 : i32, message = "hqv,hvd->hqd"}> : () -> ()
    %cst_42 = arith.constant dense<0.000000e+00> : vector<4x8x32xf32>
    %57 = tpu.matmul %55, %56, %cst_42 {dimension_numbers = #tpu.dot_dimension_numbers<[2], [1], [1], [2], [0, 0, 0, 1, 1, 2], [0], [0]>} : vector<4x8x8xbf16>, vector<4x8x32xbf16>, vector<4x8x32xf32> -> vector<4x8x32xf32>
    "tpu.trace_stop"() : () -> ()
    %cst_43 = arith.constant dense<0.000000e+00> : vector<8x32xf32>
    %58 = vector.multi_reduction <add>, %57, %cst_43 [0] : vector<4x8x32xf32> to vector<8x32xf32>
    %c0_44 = arith.constant 0 : index
    %c0_45 = arith.constant 0 : index
    %59 = vector.load %arg13[%c0_44, %c0_45] : memref<1x32xf32, #tpu.memory_space<vmem>>, vector<1x32xf32>
    %60 = vector.broadcast %59 : vector<1x32xf32> to vector<8x32xf32>
    %61 = arith.addf %58, %60 : vector<8x32xf32>
    %62 = arith.addf %61, %1 : vector<8x32xf32>
    %cst_46 = arith.constant dense<0.000000e+00> : vector<8xf32>
    %63 = vector.multi_reduction <add>, %62, %cst_46 [1] : vector<8x32xf32> to vector<8xf32>
    %64 = vector.shape_cast %63 : vector<8xf32> to vector<8x1xf32>
    %cst_47 = arith.constant 3.200000e+01 : f32
    %65 = vector.broadcast %cst_47 : f32 to vector<8x1xf32>
    %66 = arith.divf %64, %65 : vector<8x1xf32>
    %67 = vector.broadcast %66 : vector<8x1xf32> to vector<8x32xf32>
    %68 = arith.subf %62, %67 : vector<8x32xf32>
    %69 = arith.mulf %68, %68 : vector<8x32xf32>
    %cst_48 = arith.constant dense<0.000000e+00> : vector<8xf32>
    %70 = vector.multi_reduction <add>, %69, %cst_48 [1] : vector<8x32xf32> to vector<8xf32>
    %71 = vector.shape_cast %70 : vector<8xf32> to vector<8x1xf32>
    %cst_49 = arith.constant 3.200000e+01 : f32
    %72 = vector.broadcast %cst_49 : f32 to vector<8x1xf32>
    %73 = arith.divf %71, %72 : vector<8x1xf32>
    %74 = vector.broadcast %66 : vector<8x1xf32> to vector<8x32xf32>
    %75 = arith.subf %62, %74 : vector<8x32xf32>
    %cst_50 = arith.constant 9.99999974E-6 : f32
    %76 = vector.broadcast %cst_50 : f32 to vector<8x1xf32>
    %77 = arith.addf %73, %76 : vector<8x1xf32>
    %78 = math.rsqrt %77 : vector<8x1xf32>
    %79 = vector.broadcast %78 : vector<8x1xf32> to vector<8x32xf32>
    %80 = arith.mulf %75, %79 : vector<8x32xf32>
    %c0_51 = arith.constant 0 : index
    %c0_52 = arith.constant 0 : index
    %81 = vector.load %arg14[%c0_51, %c0_52] : memref<1x32xf32, #tpu.memory_space<vmem>>, vector<1x32xf32>
    %82 = vector.broadcast %81 : vector<1x32xf32> to vector<8x32xf32>
    %83 = arith.mulf %80, %82 : vector<8x32xf32>
    %c0_53 = arith.constant 0 : index
    %c0_54 = arith.constant 0 : index
    %84 = vector.load %arg15[%c0_53, %c0_54] : memref<1x32xf32, #tpu.memory_space<vmem>>, vector<1x32xf32>
    %85 = vector.broadcast %84 : vector<1x32xf32> to vector<8x32xf32>
    %86 = arith.addf %83, %85 : vector<8x32xf32>
    %c0_55 = arith.constant 0 : index
    %c0_56 = arith.constant 0 : index
    %c0_57 = arith.constant 0 : index
    %87 = vector.load %arg5[%c0_55, %c0_56, %c0_57] : memref<1x8x1xf32, #tpu.memory_space<vmem>>, vector<1x8x1xf32>
    %88 = vector.shape_cast %87 : vector<1x8x1xf32> to vector<8x1xf32>
    %89 = vector.broadcast %88 : vector<8x1xf32> to vector<8x32xf32>
    %90 = arith.mulf %86, %89 : vector<8x32xf32>
    %91 = vector.shape_cast %90 : vector<8x32xf32> to vector<1x8x32xf32>
    %c0_58 = arith.constant 0 : index
    %c0_59 = arith.constant 0 : index
    %c0_60 = arith.constant 0 : index
    %92 = vector.load %arg16[%c0_58, %c0_59, %c0_60] : memref<1x8x32xf32, #tpu.memory_space<vmem>>, vector<1x8x32xf32>
    tpu.vector_store %arg16[%c0_58, %c0_59, %c0_60], %91 {strides = array<i32>} : memref<1x8x32xf32, #tpu.memory_space<vmem>>, vector<1x8x32xf32>,
    return
  }
  func.func @transform_0(%arg0: i32, %arg1: i32) -> (i32, i32, i32) {
    %c0_i32 = arith.constant 0 : i32
    %c0_i32_0 = arith.constant 0 : i32
    return %arg0, %arg1, %c0_i32 : i32, i32, i32
  }
  func.func @transform_1(%arg0: i32, %arg1: i32) -> (i32, i32, i32) {
    %c0_i32 = arith.constant 0 : i32
    %c0_i32_0 = arith.constant 0 : i32
    %c0_i32_1 = arith.constant 0 : i32
    return %arg0, %c0_i32, %c0_i32_0 : i32, i32, i32
  }
  func.func @transform_2(%arg0: i32, %arg1: i32) -> (i32, i32, i32) {
    %c0_i32 = arith.constant 0 : i32
    %c0_i32_0 = arith.constant 0 : i32
    return %arg0, %arg1, %c0_i32 : i32, i32, i32
  }
  func.func @transform_3(%arg0: i32, %arg1: i32) -> (i32, i32, i32) {
    %c0_i32 = arith.constant 0 : i32
    %c0_i32_0 = arith.constant 0 : i32
    return %arg0, %arg1, %c0_i32 : i32, i32, i32
  }
  func.func @transform_4(%arg0: i32, %arg1: i32) -> (i32, i32, i32) {
    %c0_i32 = arith.constant 0 : i32
    %c0_i32_0 = arith.constant 0 : i32
    %c0_i32_1 = arith.constant 0 : i32
    %c0_i32_2 = arith.constant 0 : i32
    return %c0_i32, %c0_i32_0, %c0_i32_1 : i32, i32, i32
  }
  func.func @transform_5(%arg0: i32, %arg1: i32) -> (i32, i32, i32) {
    %c0_i32 = arith.constant 0 : i32
    %c0_i32_0 = arith.constant 0 : i32
    %c0_i32_1 = arith.constant 0 : i32
    %c0_i32_2 = arith.constant 0 : i32
    return %c0_i32, %c0_i32_0, %c0_i32_1 : i32, i32, i32
  }
  func.func @transform_6(%arg0: i32, %arg1: i32) -> (i32, i32, i32) {
    %c0_i32 = arith.constant 0 : i32
    %c0_i32_0 = arith.constant 0 : i32
    %c0_i32_1 = arith.constant 0 : i32
    %c0_i32_2 = arith.constant 0 : i32
    return %c0_i32, %c0_i32_0, %c0_i32_1 : i32, i32, i32
  }
  func.func @transform_7(%arg0: i32, %arg1: i32) -> (i32, i32, i32) {
    %c0_i32 = arith.constant 0 : i32
    %c0_i32_0 = arith.constant 0 : i32
    %c0_i32_1 = arith.constant 0 : i32
    %c0_i32_2 = arith.constant 0 : i32
    return %c0_i32, %c0_i32_0, %c0_i32_1 : i32, i32, i32
  }
  func.func @transform_8(%arg0: i32, %arg1: i32) -> (i32, i32, i32) {
    %c0_i32 = arith.constant 0 : i32
    %c0_i32_0 = arith.constant 0 : i32
    %c0_i32_1 = arith.constant 0 : i32
    %c0_i32_2 = arith.constant 0 : i32
    return %c0_i32, %c0_i32_0, %c0_i32_1 : i32, i32, i32
  }
  func.func @transform_9(%arg0: i32, %arg1: i32) -> (i32, i32, i32) {
    %c0_i32 = arith.constant 0 : i32
    %c0_i32_0 = arith.constant 0 : i32
    %c0_i32_1 = arith.constant 0 : i32
    %c0_i32_2 = arith.constant 0 : i32
    return %c0_i32, %c0_i32_0, %c0_i32_1 : i32, i32, i32
  }
  func.func @transform_10(%arg0: i32, %arg1: i32) -> (i32, i32, i32) {
    %c0_i32 = arith.constant 0 : i32
    %c0_i32_0 = arith.constant 0 : i32
    %c0_i32_1 = arith.constant 0 : i32
    %c0_i32_2 = arith.constant 0 : i32
    return %c0_i32, %c0_i32_0, %c0_i32_1 : i32, i32, i32
  }
  func.func @transform_11(%arg0: i32, %arg1: i32) -> (i32, i32) {
    %c0_i32 = arith.constant 0 : i32
    %c0_i32_0 = arith.constant 0 : i32
    %c0_i32_1 = arith.constant 0 : i32
    return %c0_i32, %c0_i32_0 : i32, i32
  }
  func.func @transform_12(%arg0: i32, %arg1: i32) -> (i32, i32) {
    %c0_i32 = arith.constant 0 : i32
    %c0_i32_0 = arith.constant 0 : i32
    %c0_i32_1 = arith.constant 0 : i32
    return %c0_i32, %c0_i32_0 : i32, i32
  }
  func.func @transform_13(%arg0: i32, %arg1: i32) -> (i32, i32) {
    %c0_i32 = arith.constant 0 : i32
    %c0_i32_0 = arith.constant 0 : i32
    %c0_i32_1 = arith.constant 0 : i32
    return %c0_i32, %c0_i32_0 : i32, i32
  }
  func.func @transform_14(%arg0: i32, %arg1: i32) -> (i32, i32, i32) {
    %c0_i32 = arith.constant 0 : i32
    %c0_i32_0 = arith.constant 0 : i32
    return %arg0, %arg1, %c0_i32 : i32, i32, i32
  }
  func.func @transform_15(%arg0: i32, %arg1: i32) -> (i32, i32, i32, i32) {
    %c0_i32 = arith.constant 0 : i32
    %c0_i32_0 = arith.constant 0 : i32
    %c0_i32_1 = arith.constant 0 : i32
    return %c0_i32, %arg0, %arg1, %c0_i32_0 : i32, i32, i32, i32
  }
}

</mosaic_0001>

<bundles_post_ra>
// kernel: tpu_custom_call.1
= control target key start
LH: loop header
LB: loop body
LE: loop exit
PB: predicated region body
PF: predicated region fallthrough
CT: control target
= control target key end

     0   :  { %s2378_s0 = inlined_call_operand.vmem [shape: f32[2,8,32], index: 0, kind: input, shape index: {}]   ;;  %s2379_s1 = inlined_call_operand.vmem [shape: bf16[2,8,32], index: 1, kind: input, shape index: {}]   ;;  %s2380_s2 = inlined_call_operand.vmem [shape: bf16[2,8,8], index: 2, kind: input, shape index: {}]   ;;  %s2381_s3 = inlined_call_operand.vmem [shape: f32[2,8,1], index: 3, kind: input, shape index: {}]   ;;  %s2382_s4 = inlined_call_operand.vmem [shape: bf16[4,32,8], index: 4, kind: input, shape index: {}]   ;;  %s2383_s5 = inlined_call_operand.vmem [shape: f32[4,1,8], index: 5, kind: input, shape index: {}]   ;;  %s2384_s6 = inlined_call_operand.vmem [shape: bf16[4,32,8], index: 6, kind: input, shape index: {}]   ;;  %s2385_s7 = inlined_call_operand.vmem [shape: f32[4,1,8], index: 7, kind: input, shape index: {}]   ;;  %s2386_s8 = inlined_call_operand.vmem [shape: bf16[4,32,8], index: 8, kind: input, shape index: {}]   ;;  %s2387_s9 = inlined_call_operand.vmem [shape: f32[4,1,8], index: 9, kind: input, shape index: {}]   ;;  %s2388_s10 = inlined_call_operand.vmem [shape: bf16[4,8,32], index: 10, kind: input, shape index: {}]   ;;  %s2389_s11 = inlined_call_operand.vmem [shape: f32[1,32], index: 11, kind: input, shape index: {}]   ;;  %s2390_s12 = inlined_call_operand.vmem [shape: f32[1,32], index: 12, kind: input, shape index: {}]   ;;  %s2391_s13 = inlined_call_operand.vmem [shape: f32[1,32], index: 13, kind: input, shape index: {}]   ;;  %s2392_s14 = inlined_call_operand.hbm [shape: f32[2,8,32], index: 14, kind: output, shape index: {0}]   ;;  %s2393_s15 = inlined_call_operand.hbm [shape: f32[4,2,8,8], index: 15, kind: output, shape index: {1}]  }
   0x1   :  { %2402 = sst [smem:[#allocation15_spill]] %s2378_s0 }
   0x2   :  { %2403 = sst [smem:[#allocation16_spill]] %s2379_s1 }
   0x3   :  { %2404 = sst [smem:[#allocation17_spill]] %s2380_s2 }
   0x4   :  { %2405 = sst [smem:[#allocation18_spill]] %s2392_s14 }
   0x5   :  { %21 = vsyncpa [#allocation3], 0 }
   0x6   :  { %23 = vsyncpa [#allocation3 + $0x1], 0 }
   0x7   :  { %24 = vsyncpa [#allocation5], 0 }
   0x8   :  { %26 = vsyncpa [#allocation5 + $0x1], 0  ;;  %s2029_s18 = smov 0   ;;  %s2031_s19 = smov 0  }
   0x9   :  { %s2033_s20 = smov 0   ;;  %s2035_s21 = smov 0  }
   0xa   :  { %s2037_s22 = smov 0   ;;  %s2039_s23 = smov 0  }
   0xb LB: > { %2406 = sst [smem:[#allocation8_spill]] %s1922_s18  ;;  %s1569_s24 = sadd.s32 4294967295, %s1942_s23   ;;  %s1942_s23 = sphi %s2039_s23, %s32_s23   ;;  %s1938_s22 = sphi %s2037_s22, %s2427_s22   ;;  %s1934_s21 = sphi %s2035_s21, %s2426_s21   ;;  %s1930_s20 = sphi %s2033_s20, %s2425_s20   ;;  %s1926_s19 = sphi %s2031_s19, %s2429_s19   ;;  %s1922_s18 = sphi %s2029_s18, %s2428_s18  }
   0xc   : > { %2407 = sst [smem:[#allocation9_spill]] %s1930_s20  ;;  %s1570_s25 = sadd.s32 4294967294, %s1942_s23  }
   0xd   : > { %2408 = sst [smem:[#allocation10_spill]] %s1938_s22  ;;  %s44_s26 = sadd.s32 1, %s1938_s22 }
   0xe   : > { %2409 = sst [smem:[#allocation11_spill]] %s1942_s23  ;;  %s373_s27 = sadd.s32 1, %s1930_s20 }
   0xf   : > { %p46_p0 = scmp.ge.s32.totalorder %s44_s26, 2  ;;  %p383_p1 = scmp.ne.s32.totalorder %s1930_s20, %s1926_s19 }
  0x10   : > { %p384_p2 = scmp.eq.s32.totalorder %s1569_s24, 1  ;;  %p389_p3 = scmp.ne.s32.totalorder %s1926_s19, %s1922_s18 }
  0x11   : > { %s2431_s26 = smov (%p46_p0, %s44_s26), 0  ;;  %p390_p5 = scmp.eq.s32.totalorder %s1570_s25, 1 }
  0x12   : > { %2410 = sst [smem:[#allocation12_spill]] %s2431_s26  ;;  %p2069_p4 = por %p384_p2, %p383_p1 }
  0x13   : > { %s368_s29 = ssub.s32 %s1938_s22, %s2431_s26  ;;  %p1573_p6 = scmp.ge.s32.totalorder %s1942_s23, 1 }
  0x14   : > { %p371_p7 = scmp.eq.s32.totalorder %s368_s29, 0  ;;  %p2076_p8 = por %p390_p5, %p389_p3 }
  0x15   : > { %p503_p9 = scmp.lt.s32.totalorder %s1942_s23, 3 }
  0x16   : > { %s2412_s30 = scalar_select %p2076_p8, 1, 0 }
  0x17   : > { %s2082_s16 = scalar_select %p371_p7, %s1930_s20, %s373_s27  }
  0x18   : > { %2413 = sst [smem:[#allocation13_spill]] %s2412_s30  ;;  %p504_p10 = pnand %p1573_p6, %p503_p9 }
  0x19   : > { %2414 = sst [smem:[#allocation14_spill]] %s2082_s16  ;;  %p576_p11 = scmp.lt.s32.totalorder (!%p504_p10), %s1934_s21, 1 }
  0x1a   : > { %507 = sbr.rel (%p504_p10) target bundleno = 1146 (0x47a), region = 76  ;;  %s2415_s0 = sld [smem:[#allocation15_spill]] (!%p504_p10) }
  0x1b   : > { %s2416_s1 = sld [smem:[#allocation16_spill]] (!%p504_p10) }
  0x1c   : > { %s2417_s2 = sld [smem:[#allocation17_spill]] (!%p504_p10) }
  0x1f   : > { %v1707_v0 = vld [vmem:[%s2382_s4 + $0x8] sm:$0xff]  ;;  %v1709_v1 = vld [vmem:[%s2382_s4 + $0x18] sm:$0xff]  ;;  %v1706_v4 = vld [vmem:[%s2382_s4] sm:$0xff]  ;;  %s2104_s18 = scalar_select %p576_p11, %s1934_s21, 1  ;;  %vm649_vm0 = vcmask 261120   ;;  %vm1016_vm1 = vcmask 64512  }
  0x20   : > { %v1711_v2 = vld [vmem:[%s2382_s4 + $0x28] sm:$0xff]  ;;  %v1713_v3 = vld [vmem:[%s2382_s4 + $0x38] sm:$0xff]  ;;  %659 = vmatpush.bf16.msra.mxu0 %v1707_v0  ;;  %684 = vmatpush.bf16.msra.mxu1 %v1709_v1  ;;  %v1708_v5 = vld [vmem:[%s2382_s4 + $0x10] sm:$0xff]  ;;  %vm1165_vm2 = vcmask 1043456  }
  0x21   : > { %709 = vmatpush.bf16.msra.mxu2 %v1711_v2  ;;  %734 = vmatpush.bf16.msra.mxu3 %v1713_v3  ;;  %v1710_v6 = vld [vmem:[%s2382_s4 + $0x20] sm:$0xff]  ;;  %v1712_v7 = vld [vmem:[%s2382_s4 + $0x30] sm:$0xff]  ;;  %s1576_s16 = sshll.u32 %s2104_s18, 3  ;;  %v1715_v8 = vld [vmem:[%s2384_s6 + $0x8] sm:$0xff]  ;;  %s1577_s25 = sshll.u32 %s2104_s18, 2 }
  0x22   : > { %v1717_v9 = vld [vmem:[%s2384_s6 + $0x18] sm:$0xff]  ;;  %s582_s14 = scalar_lea.vmem %s2415_s0, %s1576_s16  ;;  %v1719_v10 = vld [vmem:[%s2384_s6 + $0x28] sm:$0xff]  ;;  %v1714_v13 = vld [vmem:[%s2384_s6] sm:$0xff]  ;;  %s586_s27 = scalar_lea.vmem %s2416_s1, %s1577_s25 }
  0x23   : > { %v1721_v11 = vld [vmem:[%s2384_s6 + $0x38] sm:$0xff]  ;;  %v2130_v12 = vld [vmem:[%s582_s14] sm:$0xff]  ;;  %v1716_v14 = vld [vmem:[%s2384_s6 + $0x10] sm:$0xff]  ;;  %s593_s23 = scalar_lea.vmem %s2417_s2, %s1577_s25  ;;  %s2262_s25 = sand.u32 1, %s1926_s19  }
  0x24   : > { %660 = vmatpush.bf16.msra.mxu0 %v1706_v4  ;;  %685 = vmatpush.bf16.msra.mxu1 %v1708_v5  ;;  %v603_v15 = vpack.c.bf16 %v2130_v12, %v2130_v12  ;;  %v1718_v16 = vld [vmem:[%s2384_s6 + $0x20] sm:$0xff]  ;;  %v1720_v17 = vld [vmem:[%s2384_s6 + $0x30] sm:$0xff]  ;;  %v1727_v19 = vld [vmem:[%s2386_s8 + $0x28] sm:$0xff]  ;;  %s1575_s14 = sshll.u32 %s2262_s25, 5  ;;  %s600_s29 = scalar_lea.vmem %s2381_s3, %s1576_s16 }
  0x25   : > { %710 = vmatpush.bf16.msra.mxu2 %v1710_v6  ;;  %735 = vmatpush.bf16.msra.mxu3 %v1712_v7  ;;  %v604_v18 = vld [vmem:[%s586_s27] sm:$0xf]  ;;  %v1723_v20 = vld [vmem:[%s2386_s8 + $0x8] sm:$0xff]  ;;  %v1725_v21 = vld [vmem:[%s2386_s8 + $0x18] sm:$0xff]  ;;  %s2265_s30 = scalar_lea.vmem [#allocation4], %s1575_s14  ;;  %s1702_s18 = sshll.u32 %s1934_s21, 3 }
  0x26   : > { %v1726_v22 = vld [vmem:[%s2386_s8 + $0x20] sm:$0xff]  ;;  %v1724_v24 = vld [vmem:[%s2386_s8 + $0x10] sm:$0xff]  ;;  %v1729_v25 = vld [vmem:[%s2386_s8 + $0x38] sm:$0xff]  ;;  %s1415_s17 = scalar_lea.hbm %s2393_s15, %s1702_s18  ;;  %s1416_s20 = sshll.u32 %s2265_s30, 4  ;;  %s1417_s20 = int_to_ptr.vmem [resolvable:$true] %s1416_s20 }
  0x27   : > { %1588 = vmatmul.msk.bf16.vlgmr.msra.gmra.mxu0 %vm649_vm0, %v603_v15  ;;  %1597 = vmatmul.msk.bf16.vlgmr.msra.gmra.mxu1 %vm649_vm0, %v603_v15  ;;  %v1722_v23 = vld [vmem:[%s2386_s8] sm:$0xff]  ;;  %v1728_v26 = vld [vmem:[%s2386_s8 + $0x30] sm:$0xff]  ;;  %s1389_s14 = scalar_lea.sflag [#allocation5], %s2262_s25  ;;  %s1852_s0 = scalar_lea.hbm %s2393_s15, 64 }
  0x28   : > { %794 = vmatpush.bf16.msrb.mxu0 %v1715_v8  ;;  %819 = vmatpush.bf16.msrb.mxu1 %v1717_v9  ;;  %v1801_v33 = vld [vmem:[%s2385_s7] ss:$0 sm:$0xff]  ;;  %v1802_v34 = vld [vmem:[%s2385_s7 + $0x1] ss:$0 sm:$0xff]  ;;  %v1803_v45 = vld [vmem:[%s2385_s7 + $0x2] ss:$0 sm:$0xff] }
  0x29   : > { %1606 = vmatmul.msk.bf16.vlgmr.msra.gmra.mxu2 %vm649_vm0, %v603_v15  ;;  %1615 = vmatmul.msk.bf16.vlgmr.msra.gmra.mxu3 %vm649_vm0, %v603_v15  ;;  %v1798_v41 = vld [vmem:[%s2383_s5 + $0x1] ss:$0 sm:$0xff]  ;;  %v1797_v44 = vld [vmem:[%s2383_s5] ss:$0 sm:$0xff]  ;;  %v1804_v46 = vld [vmem:[%s2385_s7 + $0x3] ss:$0 sm:$0xff] }
  0x2a   : > { %844 = vmatpush.bf16.msrb.mxu2 %v1719_v10  ;;  %869 = vmatpush.bf16.msrb.mxu3 %v1721_v11  ;;  %v1799_v58 = vld [vmem:[%s2383_s5 + $0x2] ss:$0 sm:$0xff]  ;;  %v1800_v59 = vld [vmem:[%s2383_s5 + $0x3] ss:$0 sm:$0xff]  ;;  %v1805_v7 = vld [vmem:[%s2387_s9] ss:$0 sm:$0xff] }
  0x2b   : > { %v1806_v8 = vld [vmem:[%s2387_s9 + $0x1] ss:$0 sm:$0xff] }
  0x2c   : > { %795 = vmatpush.bf16.msrb.mxu0 %v1714_v13  ;;  %820 = vmatpush.bf16.msrb.mxu1 %v1716_v14  ;;  %v1807_v14 = vld [vmem:[%s2387_s9 + $0x2] ss:$0 sm:$0xff] }
  0x2e   : > { %845 = vmatpush.bf16.msrb.mxu2 %v1718_v16  ;;  %870 = vmatpush.bf16.msrb.mxu3 %v1720_v17 }
  0x30   : > { %926 = vmatpush.bf16.msra.mxu0 %v1723_v20  ;;  %951 = vmatpush.bf16.msra.mxu1 %v1725_v21 }
  0x32   : > { %976 = vmatpush.bf16.msra.mxu2 %v1727_v19  ;;  %1001 = vmatpush.bf16.msra.mxu3 %v1729_v25  ;;  %v1808_v25 = vld [vmem:[%s2387_s9 + $0x3] ss:$0 sm:$0xff] }
  0x34   : > { %927 = vmatpush.bf16.msra.mxu0 %v1722_v23  ;;  %952 = vmatpush.bf16.msra.mxu1 %v1724_v24 }
  0x36   : > { %977 = vmatpush.bf16.msra.mxu2 %v1726_v22  ;;  %1002 = vmatpush.bf16.msra.mxu3 %v1728_v26 }
  0x37   : > { %1624 = vmatmul.msk.bf16.vlgmr.msrb.gmra.mxu0 %vm649_vm0, %v604_v18  ;;  %1633 = vmatmul.msk.bf16.vlgmr.msrb.gmra.mxu1 %vm649_vm0, %v604_v18 }
  0x39   : > { %1642 = vmatmul.msk.bf16.vlgmr.msrb.gmra.mxu2 %vm649_vm0, %v604_v18  ;;  %1651 = vmatmul.msk.bf16.vlgmr.msrb.gmra.mxu3 %vm649_vm0, %v604_v18 }
  0x47   : > { %1660 = vmatmul.msk.bf16.vlgmr.msra.gmra.mxu0 %vm649_vm0, %v604_v18  ;;  %1669 = vmatmul.msk.bf16.vlgmr.msra.gmra.mxu1 %vm649_vm0, %v604_v18 }
  0x49   : > { %1678 = vmatmul.msk.bf16.vlgmr.msra.gmra.mxu2 %vm649_vm0, %v604_v18  ;;  %1687 = vmatmul.msk.bf16.vlgmr.msra.gmra.mxu3 %vm649_vm0, %v604_v18 }
  0xa4   : > { %v662_v27 = vpop.f32.mrf.mxu0  ;;  %v687_v28 = vpop.f32.mrf.mxu1 }
  0xa5   : > { %v688_v49 = vadd.f32 %v1798_v41, %v687_v28  ;;  %v663_v52 = vadd.f32 %v1797_v44, %v662_v27 }
  0xa7   : > { %v1009_v57 = vpack.c.bf16 %v688_v49, %v688_v49  ;;  %v1008_v62 = vpack.c.bf16 %v663_v52, %v663_v52 }
  0xac   : > { %v712_v29 = vpop.f32.mrf.mxu2  ;;  %v737_v30 = vpop.f32.mrf.mxu3 }
  0xad   : > { %v664_v31 = vpop.f32.mrf.mxu0  ;;  %v689_v32 = vpop.f32.mrf.mxu1  ;;  %v713_v1 = vadd.f32 %v1799_v58, %v712_v29  ;;  %v738_v2 = vadd.f32 %v1800_v59, %v737_v30 }
  0xae   : > { %v1097_v32 = vld [vmem:[%s593_s23] sm:$0xf]  ;;  %s1418_s23 = sshll.u32 %s1415_s17, 4  ;;  %s1419_s23 = int_to_ptr.hbm [resolvable:$true] %s1418_s23 }
  0xaf   : > { %v1010_v5 = vpack.c.bf16 %v713_v1, %v713_v1  ;;  %v1011_v6 = vpack.c.bf16 %v738_v2, %v738_v2  ;;  %s1846_s24 = sshra.s32 %s1419_s23, 4  ;;  %s1847_s24 = int_to_ptr.hbm [resolvable:$true] %s1846_s24 }
  0xb0   : > { %s1848_s26 = scalar_lea.hbm %s1847_s24, 32  ;;  %p1853_p1 = scmp.lt.s32.totalorder %s1847_s24, %s2393_s15 }
  0xb1   : > { %p1849_p12 = scmp.ne.s32.totalorder %s1847_s24, %s1848_s26  ;;  %p1854_p2 = scmp.lt.s32.totalorder %s1852_s0, %s1848_s26 }
  0xb3   : > { %p1850_p13 = pnand %p1849_p12, %p2069_p4  ;;  %p1855_p3 = por %p1854_p2, %p1853_p1 }
  0xb4   : > { %v714_v35 = vpop.f32.mrf.mxu2  ;;  %v739_v36 = vpop.f32.mrf.mxu3 }
  0xb5   : > { %v797_v37 = vpop.f32.mrf.mxu0  ;;  %v822_v38 = vpop.f32.mrf.mxu1  ;;  %p1851_p0 = pneg %p1850_p13 }
  0xb6   : > { %v798_v39 = vadd.f32 %v1801_v33, %v797_v37  ;;  %v823_v40 = vadd.f32 %v1802_v34, %v822_v38  ;;  %v1098_v33 = vunpack.c.l.bf16 %v1097_v32  ;;  %v1245_v32 = vld [vmem:[%s2388_s10 + $0x8] sm:$0xf] }
  0xb7   : > { %p1856_p5 = pnand %p1855_p3, %p1851_p0 }
  0xb8   : > { %v1012_v42 = vpack.c.bf16 %v798_v39, %v798_v39  ;;  %v1013_v43 = vpack.c.bf16 %v823_v40, %v823_v40  ;;  %vm2241_vm3 = vcmp.gt.f32.partialorder %v1098_v33, 0.5  ;;  %v1289_v33 = vsel %vm1165_vm2, %v1245_v32, 0 }
  0xba   : > { %v1021_v47 = vsel %vm1016_vm1, %v1012_v42, 0  ;;  %v1040_v48 = vsel %vm1016_vm1, %v1013_v43, 0 }
  0xbb   : > { %1030 = vmatpush.bf16.xpose.msrb.mxu0 %v1021_v47  ;;  %1049 = vmatpush.bf16.xpose.msrb.mxu1 %v1040_v48 }
  0xbc   : > { %v847_v50 = vpop.f32.mrf.mxu2  ;;  %v872_v51 = vpop.f32.mrf.mxu3 }
  0xbd   : > { %v848_v53 = vadd.f32 %v1803_v45, %v847_v50  ;;  %v873_v54 = vadd.f32 %v1804_v46, %v872_v51  ;;  %v799_v55 = vpop.f32.mrf.mxu0  ;;  %v824_v56 = vpop.f32.mrf.mxu1 }
  0xbf   : > { %v1014_v60 = vpack.c.bf16 %v848_v53, %v848_v53  ;;  %v1015_v61 = vpack.c.bf16 %v873_v54, %v873_v54 }
  0xc1   : > { %v1059_v63 = vsel %vm1016_vm1, %v1014_v60, 0  ;;  %v1078_v0 = vsel %vm1016_vm1, %v1015_v61, 0 }
  0xc2   : > { %1068 = vmatpush.bf16.xpose.msrb.mxu2 %v1059_v63  ;;  %1087 = vmatpush.bf16.xpose.msrb.mxu3 %v1078_v0 }
  0xc3   : > { %1688 = vmatmul.msk.bf16.vlgmr.msrb.gmra.mxu0 %vm1016_vm1, %v1008_v62  ;;  %1689 = vmatmul.msk.bf16.vlgmr.msrb.gmra.mxu1 %vm1016_vm1, %v1009_v57 }
  0xc4   : > { %v849_v3 = vpop.f32.mrf.mxu2  ;;  %v874_v4 = vpop.f32.mrf.mxu3 }
  0xc5   : > { %v929_v9 = vpop.f32.mrf.mxu0  ;;  %v954_v10 = vpop.f32.mrf.mxu1 }
  0xc6   : > { %v930_v11 = vadd.f32 %v1805_v7, %v929_v9  ;;  %v955_v13 = vadd.f32 %v1806_v8, %v954_v10 }
  0xc8   : > { %v1158_v15 = vpack.c.bf16 %v930_v11, %v930_v11  ;;  %v1159_v16 = vpack.c.bf16 %v955_v13, %v955_v13 }
  0xc9   : > { %1690 = vmatmul.msk.bf16.vlgmr.msrb.gmra.mxu2 %vm1016_vm1, %v1010_v5  ;;  %1691 = vmatmul.msk.bf16.vlgmr.msrb.gmra.mxu3 %vm1016_vm1, %v1011_v6 }
  0xca   : > { %v1167_v18 = vsel %vm1165_vm2, %v1158_v15, 0  ;;  %v1186_v19 = vsel %vm1165_vm2, %v1159_v16, 0 }
  0xcb   : > { %1176 = vmatpush.bf16.msra.mxu0 %v1167_v18  ;;  %1195 = vmatpush.bf16.msra.mxu1 %v1186_v19 }
  0xcc   : > { %v979_v17 = vpop.f32.mrf.mxu2  ;;  %v1004_v26 = vpop.f32.mrf.mxu3 }
  0xcd   : > { %v980_v20 = vadd.f32 %v1807_v14, %v979_v17  ;;  %v931_v22 = vpop.f32.mrf.mxu0  ;;  %v956_v23 = vpop.f32.mrf.mxu1  ;;  %v1005_v28 = vadd.f32 %v1808_v25, %v1004_v26 }
  0xcf   : > { %v1160_v21 = vpack.c.bf16 %v980_v20, %v980_v20  ;;  %v1161_v29 = vpack.c.bf16 %v1005_v28, %v1005_v28  ;;  %v1243_v28 = vld [vmem:[%s2388_s10] sm:$0xf] }
  0xd1   : > { %v1205_v24 = vsel %vm1165_vm2, %v1160_v21, 0  ;;  %v1224_v30 = vsel %vm1165_vm2, %v1161_v29, 0  ;;  %v1251_v29 = vsel %vm1165_vm2, %v1243_v28, 0 }
  0xd2   : > { %1214 = vmatpush.bf16.msra.mxu2 %v1205_v24  ;;  %1233 = vmatpush.bf16.msra.mxu3 %v1224_v30  ;;  %v1244_v30 = vld [vmem:[%s2388_s10 + $0x4] sm:$0xf] }
  0xd3   : > { %1260 = vmatpush.bf16.msrb.mxu0 %v1251_v29 }
  0xd4   : > { %v981_v27 = vpop.f32.mrf.mxu2  ;;  %v1006_v31 = vpop.f32.mrf.mxu3 }
  0xd5   : > { %v1270_v31 = vsel %vm1165_vm2, %v1244_v30, 0 }
  0xd6   : > { %1279 = vmatpush.bf16.msrb.mxu1 %v1270_v31  ;;  %1298 = vmatpush.bf16.msrb.mxu2 %v1289_v33 }
 0x140   : > { %v1032_v34 = vpop.f32.mrf.mxu0  ;;  %v1051_v35 = vpop.f32.mrf.mxu1 }
 0x141   : > { %v1093_v37 = vmul.f32 0.35355338, %v1032_v34  ;;  %v1094_v40 = vmul.f32 0.35355338, %v1051_v35  ;;  %v1246_v34 = vld [vmem:[%s2388_s10 + $0xc] sm:$0xf] }
 0x142   : > { %v1308_v35 = vsel %vm1165_vm2, %v1246_v34, 0 }
 0x143   : > { %v1102_v38 = vsel %vm2241_vm3, -1e+30, %v1093_v37  ;;  %v1103_v43 = vsel %vm2241_vm3, -1e+30, %v1094_v40  ;;  %1317 = vmatpush.bf16.msrb.mxu3 %v1308_v35 }
 0x144   : > { %v1106_v39 = vsel %vm1016_vm1, %v1102_v38, -inf  ;;  %v1109_v46 = vsel %vm1016_vm1, %v1103_v43, -inf }
 0x145   : > { %1107 = vmax.xlane.f32.xlu1 %v1106_v39 }
 0x148   : > { %v1034_v41 = vpop.f32.mrf.mxu0  ;;  %v1053_v42 = vpop.f32.mrf.mxu1 }
 0x14c   : > { %v1070_v44 = vpop.f32.mrf.mxu2  ;;  %v1089_v45 = vpop.f32.mrf.mxu3 }
 0x14d   : > { %v1095_v47 = vmul.f32 0.35355338, %v1070_v44  ;;  %1110 = vmax.xlane.f32.xlu1 %v1109_v46  ;;  %v1096_v50 = vmul.f32 0.35355338, %v1089_v45 }
 0x14f   : > { %v1104_v48 = vsel %vm2241_vm3, -1e+30, %v1095_v47  ;;  %v1105_v53 = vsel %vm2241_vm3, -1e+30, %v1096_v50 }
 0x150   : > { %v1112_v49 = vsel %vm1016_vm1, %v1104_v48, -inf  ;;  %v1115_v54 = vsel %vm1016_vm1, %v1105_v53, -inf }
 0x151   : > { %1113 = vmax.xlane.f32.xlu0 %v1112_v49 }
 0x154   : > { %v1072_v51 = vpop.f32.mrf.mxu2  ;;  %v1091_v52 = vpop.f32.mrf.mxu3 }
 0x159   : > { %1116 = vmax.xlane.f32.xlu0 %v1115_v54 }
 0x1b8   : > { %v1108_v55 = vpop.xlane.xlu1 %1107 }
 0x1b9   : > { %v1118_v56 = vsub.f32 %v1102_v38, %v1108_v55 }
 0x1bb   : > { %v1122_v57 = vmul.f32 1.442695, %v1118_v56 }
 0x1bd   : > { %1812 = vpow2.f32 %v1122_v57 }
 0x1c0   : > { %v1111_v58 = vpop.xlane.xlu1 %1110 }
 0x1c1   : > { %v1119_v59 = vsub.f32 %v1103_v43, %v1111_v58 }
 0x1c3   : > { %v1813_v60 = vpop.eup %1812  ;;  %v1124_v61 = vmul.f32 1.442695, %v1119_v59 }
 0x1c4   : > { %v1114_v62 = vpop.xlane.xlu0 %1113  ;;  %v1130_v63 = vsel %vm1016_vm1, %v1813_v60, 0.0 }
 0x1c5   : > { %1814 = vpow2.f32 %v1124_v61  ;;  %v1120_v0 = vsub.f32 %v1104_v48, %v1114_v62  ;;  %1131 = vadd.xlane.f32.xlu0 %v1130_v63 }
 0x1c7   : > { %v1126_v1 = vmul.f32 1.442695, %v1120_v0 }
 0x1c9   : > { %1816 = vpow2.f32 %v1126_v1 }
 0x1cb   : > { %v1815_v2 = vpop.eup %1814 }
 0x1cc   : > { %v1117_v3 = vpop.xlane.xlu0 %1116  ;;  %v1133_v4 = vsel %vm1016_vm1, %v1815_v2, 0.0 }
 0x1cd   : > { %v1121_v5 = vsub.f32 %v1105_v53, %v1117_v3  ;;  %1134 = vadd.xlane.f32.xlu1 %v1133_v4  ;;  %v1944_v3 = vmov 32.0   ;;  %v1375_v4 = vld [vmem:[%s600_s29] sm:$0xff] }
 0x1cf   : > { %v1817_v6 = vpop.eup %1816  ;;  %v1128_v7 = vmul.f32 1.442695, %v1121_v5  ;;  %v1945_v5 = vmov 0  }
 0x1d0   : > { %v1136_v8 = vsel %vm1016_vm1, %v1817_v6, 0.0  ;;  %1795 = vset.pattern.permute.xlu1 %v1945_v5  ;;  %1796 = vset.pattern.permute.xlu0 %v1945_v5 }
 0x1d1   : > { %1818 = vpow2.f32 %v1128_v7  ;;  %1137 = vadd.xlane.f32.xlu2 %v1136_v8 }
 0x1d7   : > { %v1819_v9 = vpop.eup %1818 }
 0x1d8   : > { %v1139_v10 = vsel %vm1016_vm1, %v1819_v9, 0.0 }
 0x1d9   : > { %1140 = vadd.xlane.f32.xlu2 %v1139_v10 }
 0x1e6   : > { %1378 = vperm.xlu1 %1795, %v1375_v4  }
 0x238   : > { %v1132_v11 = vpop.xlane.xlu0 %1131 }
 0x239   : > { %1820 = vrcp.f32 %v1132_v11 }
 0x23f   : > { %v1821_v13 = vpop.eup %1820 }
 0x240   : > { %v1146_v14 = vmul.f32 %v1821_v13, %v1813_v60  ;;  %v1135_v15 = vpop.xlane.xlu1 %1134  ;;  %v1809_v60 = vld [vmem:[%s2389_s11] ss:$0 sm:$0xff] }
 0x241   : > { %1822 = vrcp.f32 %v1135_v15 }
 0x242   : > { %v1154_v16 = vpack.c.bf16 %v1146_v14, %v1146_v14  ;;  %1150 = vst.msk [vmem:[%s2265_s30] sm:$0xff] %vm1016_vm1, %v1146_v14 }
 0x244   : > { %v1138_v17 = vpop.xlane.xlu2 %1137  ;;  %1692 = vmatmul.msk.bf16.vlgmr.msra.gmra.mxu0 %vm1016_vm1, %v1154_v16 }
 0x245   : > { %1824 = vrcp.f32 %v1138_v17 }
 0x247   : > { %v1823_v18 = vpop.eup %1822 }
 0x248   : > { %v1147_v19 = vmul.f32 %v1823_v18, %v1815_v2 }
 0x24a   : > { %v1155_v20 = vpack.c.bf16 %v1147_v19, %v1147_v19  ;;  %1151 = vst.msk [vmem:[%s2265_s30 + $0x8] sm:$0xff] %vm1016_vm1, %v1147_v19 }
 0x24b   : > { %v1825_v21 = vpop.eup %1824 }
 0x24c   : > { %v1148_v22 = vmul.f32 %v1825_v21, %v1817_v6  ;;  %v1141_v23 = vpop.xlane.xlu2 %1140  ;;  %1693 = vmatmul.msk.bf16.vlgmr.msra.gmra.mxu1 %vm1016_vm1, %v1155_v20 }
 0x24d   : > { %1826 = vrcp.f32 %v1141_v23 }
 0x24e   : > { %v1156_v24 = vpack.c.bf16 %v1148_v22, %v1148_v22  ;;  %1152 = vst.msk [vmem:[%s2265_s30 + $0x10] sm:$0xff] %vm1016_vm1, %v1148_v22  ;;  %1828 = vrcp.f32 %v1944_v3 }
 0x250   : > { %1694 = vmatmul.msk.bf16.vlgmr.msra.gmra.mxu2 %vm1016_vm1, %v1156_v24 }
 0x253   : > { %v1827_v25 = vpop.eup %1826 }
 0x254   : > { %v1149_v26 = vmul.f32 %v1827_v25, %v1819_v9 }
 0x256   : > { %v1157_v27 = vpack.c.bf16 %v1149_v26, %v1149_v26  ;;  %1153 = vst.msk [vmem:[%s2265_s30 + $0x18] sm:$0xff] %vm1016_vm1, %v1149_v26 }
 0x258   : > { %1695 = vmatmul.msk.bf16.vlgmr.msra.gmra.mxu3 %vm1016_vm1, %v1157_v27 }
 0x2c1   : > { %v1178_v36 = vpop.f32.mrf.mxu0 }
 0x2c2   : > { %v1239_v37 = vpack.c.bf16 %v1178_v36, %v1178_v36 }
 0x2c4   : > { %1696 = vmatmul.msk.bf16.vlgmr.msrb.gmra.mxu0 %vm1016_vm1, %v1239_v37 }
 0x2c9   : > { %v1180_v38 = vpop.f32.mrf.mxu0  ;;  %v1197_v39 = vpop.f32.mrf.mxu1 }
 0x2ca   : > { %v1240_v40 = vpack.c.bf16 %v1197_v39, %v1197_v39 }
 0x2cc   : > { %1697 = vmatmul.msk.bf16.vlgmr.msrb.gmra.mxu1 %vm1016_vm1, %v1240_v40 }
 0x2d1   : > { %v1199_v41 = vpop.f32.mrf.mxu1 }
 0x2d3   : > { %v1216_v42 = vpop.f32.mrf.mxu2 }
 0x2d4   : > { %v1241_v43 = vpack.c.bf16 %v1216_v42, %v1216_v42 }
 0x2d6   : > { %1698 = vmatmul.msk.bf16.vlgmr.msrb.gmra.mxu2 %vm1016_vm1, %v1241_v43 }
 0x2db   : > { %v1218_v44 = vpop.f32.mrf.mxu2  ;;  %v1235_v45 = vpop.f32.mrf.mxu3 }
 0x2dc   : > { %v1242_v46 = vpack.c.bf16 %v1235_v45, %v1235_v45 }
 0x2de   : > { %1699 = vmatmul.msk.bf16.vlgmr.msrb.gmra.mxu3 %vm1016_vm1, %v1242_v46 }
 0x2e3   : > { %v1237_v47 = vpop.f32.mrf.mxu3 }
 0x341   : > { %v1262_v48 = vpop.f32.mrf.mxu0 }
 0x342   : > { %v1323_v54 = vsel %vm649_vm0, %v1262_v48, 0.0 }
 0x349   : > { %v1264_v49 = vpop.f32.mrf.mxu0  ;;  %v1281_v50 = vpop.f32.mrf.mxu1 }
 0x34a   : > { %v1324_v53 = vsel %vm649_vm0, %v1281_v50, 0.0 }
 0x34b   : > { %v1325_v56 = vadd.f32 %v1324_v53, %v1323_v54 }
 0x351   : > { %v1283_v51 = vpop.f32.mrf.mxu1 }
 0x359   : > { %v1300_v52 = vpop.f32.mrf.mxu2 }
 0x35a   : > { %v1326_v55 = vsel %vm649_vm0, %v1300_v52, 0.0 }
 0x35b   : > { %v1327_v57 = vadd.f32 %v1326_v55, %v1325_v56 }
 0x361   : > { %v1302_v58 = vpop.f32.mrf.mxu2  ;;  %v1319_v59 = vpop.f32.mrf.mxu3 }
 0x362   : > { %v1328_v61 = vsel %vm649_vm0, %v1319_v59, 0.0 }
 0x363   : > { %v1329_v62 = vadd.f32 %v1328_v61, %v1327_v57 }
 0x365   : > { %v1334_v63 = vadd.f32 %v1809_v60, %v1329_v62 }
 0x367   : > { %v1335_v0 = vadd.f32 %v1334_v63, %v2130_v12  ;;  %v1829_v12 = vpop.eup %1828 }
 0x368   : > { %v1340_v6 = vmul.f32 32.0, %v1829_v12  ;;  %vm1344_vm4 = vweird.f32 %v1829_v12 }
 0x369   : > { %v1321_v1 = vpop.f32.mrf.mxu3  ;;  %v1336_v2 = vsel %vm649_vm0, %v1335_v0, 0.0 }
 0x36a   : > { %1337 = vadd.xlane.f32.xlu2 %v1336_v2  ;;  %v1341_v7 = vsub.f32 1.0, %v1340_v6 }
 0x36c   : > { %v1342_v8 = vmul.f32 %v1829_v12, %v1341_v7 }
 0x36e   : > { %v1343_v9 = vadd.f32 %v1829_v12, %v1342_v8 }
 0x370   : > { %v1345_v10 = vsel %vm1344_vm4, %v1829_v12, %v1343_v9 }
 0x3dd   : > { %v1338_v11 = vpop.xlane.xlu2 %1337 }
 0x3de   : > { %v1346_v13 = vmul.f32 %v1345_v10, %v1338_v11 }
 0x3e0   : > { %v1347_v14 = vsub.f32 %v1335_v0, %v1346_v13 }
 0x3e2   : > { %v1348_v15 = vmul.f32 %v1347_v14, %v1347_v14 }
 0x3e4   : > { %v1349_v16 = vsel %vm649_vm0, %v1348_v15, 0.0 }
 0x3e5   : > { %1350 = vadd.xlane.f32.xlu0 %v1349_v16 }
 0x3e6   : > { %1859 = shalt.err (!%p1856_p5)
}
 0x3e7   : > { %s1946_s30 = smov 128   ;;  %s1947_s16 = smov 256   ;;  %v1810_v26 = vld [vmem:[%s2390_s12] ss:$0 sm:$0xff]  ;;  %v1379_v31 = vpop.permute.xlu1 %1378 }
 0x3e8   : > { %s1948_s27 = smov 8   ;;  %s1574_s0 = sshll.u32 %s2262_s25, 3  ;;  %v1811_v28 = vld [vmem:[%s2391_s13] ss:$0 sm:$0xff] }
 0x3e9   : > { %1731 = dma.vmem_to_hbm [thread:$0]  (%p2069_p4), %s1417_s20, 512, %s1419_s23, %s1389_s14, %s1946_s30, %s1947_s16, %s1948_s27  }
 0x3ea   : > { %s2420_s24 = sld [smem:[#allocation18_spill]]  ;;  %s568_s22 = scalar_lea.vmem [#allocation2], %s1574_s0 }
 0x3eb   : > { %s1402_s29 = sshll.u32 %s568_s22, 4  ;;  %s1384_s16 = scalar_lea.sflag [#allocation3], %s2262_s25  ;;  %s1403_s29 = int_to_ptr.vmem [resolvable:$true] %s1402_s29 }
 0x3f0   : > { %s1400_s26 = scalar_lea.hbm %s2420_s24, %s1702_s18  ;;  %s1880_s0 = scalar_lea.hbm %s2420_s24, 16 }
 0x3f1   : > { %s1404_s30 = sshll.u32 %s1400_s26, 4  ;;  %s1405_s30 = int_to_ptr.hbm [resolvable:$true] %s1404_s30 }
 0x3f2   : > { %s1874_s27 = sshra.s32 %s1405_s30, 4  ;;  %s1875_s27 = int_to_ptr.hbm [resolvable:$true] %s1874_s27 }
 0x3f3   : > { %s1876_s21 = scalar_lea.hbm %s1875_s27, 8  ;;  %p1881_p10 = scmp.lt.s32.totalorder %s1875_s27, %s2420_s24 }
 0x3f4   : > { %p1877_p6 = scmp.ne.s32.totalorder %s1875_s27, %s1876_s21  ;;  %p1882_p11 = scmp.lt.s32.totalorder %s1880_s0, %s1876_s21 }
 0x3f6   : > { %p1878_p7 = pnand %p1877_p6, %p2069_p4  ;;  %p1883_p12 = por %p1882_p11, %p1881_p10 }
 0x3f8   : > { %p1879_p9 = pneg %p1878_p7 }
 0x3fa   : > { %p1884_p13 = pnand %p1883_p12, %p1879_p9 }
 0x458   : > { %v1351_v17 = vpop.xlane.xlu0 %1350 }
 0x459   : > { %v1352_v18 = vmul.f32 %v1351_v17, %v1345_v10 }
 0x45b   : > { %v1353_v19 = vadd.f32 1e-05, %v1352_v18 }
 0x45d   : > { %1830 = vrsqrt.f32 %v1353_v19  ;;  %vm1360_vm6 = vweird.f32 %v1353_v19 }
 0x463   : > { %v1831_v20 = vpop.eup %1830 }
 0x464   : > { %v1355_v21 = vmul.f32 %v1831_v20, %v1353_v19  ;;  %vm1361_vm5 = vweird.f32 %v1831_v20 }
 0x465   : > { %vm1362_vm7 = vmor %vm1360_vm6, %vm1361_vm5 }
 0x466   : > { %v1356_v22 = vmul.f32 %v1831_v20, %v1355_v21 }
 0x468   : > { %v1357_v23 = vmul.f32 0.5, %v1356_v22 }
 0x46a   : > { %v1358_v24 = vsub.f32 1.5, %v1357_v23 }
 0x46c   : > { %v1359_v25 = vmul.f32 %v1831_v20, %v1358_v24 }
 0x46e   : > { %v1363_v27 = vsel %vm1362_vm7, %v1831_v20, %v1359_v25 }
 0x46f   : > { %v1364_v29 = vmul.f32 %v1363_v27, %v1347_v14 }
 0x471   : > { %v1369_v30 = vmul.f32 %v1810_v26, %v1364_v29 }
 0x473   : > { %v1374_v32 = vadd.f32 %v1811_v28, %v1369_v30 }
 0x475   : > { %v1381_v33 = vmul.f32 %v1379_v31, %v1374_v32 }
 0x477   : > { %1382 = vst.msk [vmem:[%s568_s22] sm:$0xff] %vm649_vm0, %v1381_v33 }
 0x478   : > { %1887 = shalt.err (!%p1884_p13)
}
 0x479   : > { %1730 = dma.vmem_to_hbm [thread:$0]  (%p2069_p4), %s1403_s29, 128, %s1405_s30, %s1384_s16  }
 0x47a PF: > { %s2421_s25 = sld [smem:[#allocation11_spill]] }
 0x47b   : > { %s2422_s20 = sld [smem:[#allocation8_spill]] }
 0x480   : > { %p1741_p0 = scmp.ge.s32.totalorder %s2421_s25, 2 }
 0x481   : > { %s1433_s14 = sand.u32 1, %s2422_s20  }
 0x482   : > { %p1735_p1 = pnand %p1741_p0, %p2076_p8  ;;  %s1434_s26 = scalar_lea.sflag [#allocation3], %s1433_s14 }
 0x484   : > { %p1736_p2 = pneg %p1735_p1 }
 0x486   : > { %1913 = dma.done.wait (%p1736_p2), %s1434_s26, 128  }
 0x487   : > { %1915 = vsyncadd (%p1736_p2), %s1434_s26, 4294967168  ;;  %s1444_s22 = scalar_lea.sflag [#allocation5], %s1433_s14 }
 0x488   : > { %1917 = dma.done.wait (%p1736_p2), %s1444_s22, 512  }
 0x489   : > { %1919 = vsyncadd (%p1736_p2), %s1444_s22, 4294966784  ;;  %s32_s23 = sadd.s32 1, %s2421_s25   ;;  %s2424_s28 = sld [smem:[#allocation9_spill]] }
 0x48a   : > { %p29_p3 = scmp.ge.s32.totalorder %s32_s23, 4   ;;  %s2425_s20 = sld [smem:[#allocation14_spill]] }
 0x48b   : > { %s2426_s21 = sld [smem:[#allocation10_spill]]  ;;  %s2428_s18 = smov %s1926_s19 }
 0x48c   : > { %s2427_s22 = sld [smem:[#allocation12_spill]]  ;;  %31 = sbr.rel (!%p29_p3) target bundleno = 11 (0xb), region = 137 }
 0x48f   : > { %s2429_s19 = smov %s2424_s28 }
 0x491   :  { %1450 = vsyncpa [#allocation3], 1 }
 0x492   :  { %1452 = vsyncpa [#allocation3 + $0x1], 1 }
 0x493   :  { %1453 = vsyncpa [#allocation5], 1 }
 0x494   :  { %1455 = vsyncpa [#allocation5 + $0x1], 1 }

</bundles_post_ra>
